<compile_context>
chip_gen: v5e
topology: v5e:2x2
jax: 0.10.0
libtpu: 0.0.40
codegen_flags: <defaults>
</compile_context>

<pallas_src>
import math

import jax
import jax.numpy as jnp
from jax.experimental import pallas as pl
from jax.experimental.pallas import tpu as pltpu


def _cdiv(a: int, b: int) -> int:
    return -(-a // b)


def _chip_tuning():
    """Returns (target_block_bytes, min_grid_steps) for the local TPU generation."""
    kind = ""
    try:
        kind = jax.devices()[0].device_kind.lower()
    except Exception:  # pragma: no cover - interpret / CPU fallback
        pass
    if "v7" in kind:
        # Two TensorCores share the chip; 64 MiB physical VMEM (32 MiB scoped).
        # Want >= 2 grid steps so both TCs get work, but never tiny blocks.
        return 3 * 1024 * 1024, 2
    if "v5" in kind and ("lite" in kind or "v5e" in kind):
        # Single TC, 16 MiB scoped-VMEM default -> keep blocks at ~2 MiB so
        # 2x(in + out) double buffers stay well inside the default limit.
        return 2 * 1024 * 1024, 1
    # v6e (and other large-VMEM single-TC parts): 32 MiB scoped default.
    return 4 * 1024 * 1024, 1


def _pick_lane_width(F: int) -> int:
    """Widest power-of-two multiple of 128 (<= 2048) dividing F (F % 128 == 0)."""
    for cand in (2048, 1024, 512, 256, 128):
        if F % cand == 0:
            return cand
    return 128


def _pick_row_tile(num_rows: int, bytes_per_row: int, target_bytes: int,
                   min_blocks: int) -> int:
    """Row tile: a multiple of 8 sublanes (or the full extent), sized to
    ~target_bytes; optionally split into >= min_blocks blocks (v7x megacore)
    but never shrunk below ~1 MiB per block to do so."""
    t = max(8, (target_bytes // max(1, bytes_per_row)) // 8 * 8)
    if min_blocks > 1 and _cdiv(num_rows, min(t, num_rows)) < min_blocks:
        floor_t = max(8, ((1 << 20) // max(1, bytes_per_row)) // 8 * 8)
        want_t = max(8, (num_rows // min_blocks) // 8 * 8)
        cand = max(floor_t, want_t)
        if cand < t:
            t = cand
    if t >= num_rows:
        t = num_rows  # full extent is always a legal block dimension
    return t


def _drop_path_sample_scale_kernel(scale_smem_ref, x_ref, o_ref):
    # Per-sample path: scale_smem_ref is a (B,) fp32 scalar-prefetch operand in
    # SMEM; x_ref / o_ref are (1, rt, L) tiles of one sample.
    # fp32 math + one cast on store: the op is HBM-bound everywhere, and fp32
    # keeps results bit-identical across generations (v5e's VPU has no bf16).
    s = scale_smem_ref[pl.program_id(0)]
    o_ref[...] = (x_ref[...].astype(jnp.float32) * s).astype(o_ref.dtype)


def _drop_path_row_scale_kernel(scale_ref, x_ref, o_ref):
    # Row-scale path: scale_ref is a (bt, 1) fp32 tile (one scale per slab row);
    # x_ref / o_ref are (bt, lt) tiles (lt = full extent for ragged features).
    o_ref[...] = (x_ref[...].astype(jnp.float32) * scale_ref[...]).astype(o_ref.dtype)


def drop_path(x, drop_prob: float = 0.0, training: bool = False, *, key=None):
    """JAX/Pallas equivalent of the PyTorch drop_path forward."""
    if drop_prob == 0.0 or not training:
        return x
    if not 0.0 < drop_prob < 1.0:
        # torch silently produces NaNs at drop_prob == 1.0 (0 * inf); guard it.
        raise ValueError(f"drop_prob must lie in [0, 1), got {drop_prob}")
    if key is None:
        raise ValueError("drop_path needs a PRNG `key` when training with drop_prob > 0")
    keep_prob = 1.0 - drop_prob

    orig_shape, orig_dtype = x.shape, x.dtype
    B = x.shape[0]
    F = math.prod(x.shape[1:]) if x.ndim > 1 else 1
    itemsize = jnp.dtype(orig_dtype).itemsize
    target_bytes, min_steps = _chip_tuning()

    # Per-sample keep/drop mask with the 1/keep_prob scale folded in (fp32).
    # floor(keep_prob + U[0,1)) -> 1 with prob keep_prob else 0 (torch semantics).
    u = jax.random.uniform(key, (B,), dtype=jnp.float32)
    scale = jnp.floor(keep_prob + u) * (1.0 / keep_prob)              # (B,) fp32

    cost = pl.CostEstimate(flops=B * F, transcendentals=0,
                           bytes_accessed=2 * B * F * itemsize + B * 4)

    lane_aligned = (F % 128 == 0)

    # ---------------------------------------------------------------- path A
    # Large, lane-aligned samples: (B, R, L) view, per-sample SMEM scale via
    # scalar prefetch (no repeat, no per-row scale array, no extra VMEM stream).
    # Only taken when each sample carries >= 1 MiB so the per-sample grid keeps
    # blocks >= 1 MiB and >= 8 sublanes per tile.
    if lane_aligned and F * itemsize >= (1 << 20):
        L = _pick_lane_width(F)
        R = F // L
        rt = _pick_row_tile(R, L * itemsize, target_bytes,
                            max(1, _cdiv(min_steps, B)))
        grid = (B, _cdiv(R, rt))                  # partial edge blocks are masked
        out = pl.pallas_call(
            _drop_path_sample_scale_kernel,
            out_shape=jax.ShapeDtypeStruct((B, R, L), orig_dtype),
            grid_spec=pltpu.PrefetchScalarGridSpec(
                num_scalar_prefetch=1,
                grid=grid,
                in_specs=[pl.BlockSpec((1, rt, L), lambda b, j, s: (b, j, 0))],
                out_specs=pl.BlockSpec((1, rt, L), lambda b, j, s: (b, j, 0)),
            ),
            compiler_params=pltpu.CompilerParams(
                dimension_semantics=("parallel", "parallel")),
            cost_estimate=cost,
        )(scale, x.reshape(B, R, L))
        return out.reshape(orig_shape)

    # ---------------------------------------------------------------- path B
    # Fat-sublane slab with a per-row fp32 scale (tiny (bt,1) VMEM tile).
    #  * lane-aligned but small samples: rows = B*R, cols = L (merging samples
    #    keeps blocks near the byte target even when B is large / F is small).
    #  * ragged feature counts (F % 128 != 0): rows = B, cols = F with a
    #    full-extent (or 128-multiple, edge-masked) lane dim -> no pad/slice.
    if lane_aligned:
        L = _pick_lane_width(F)
        R = F // L
        rows, cols = B * R, L
        scale_rows = scale[:, None] if R == 1 else jnp.repeat(scale, R)[:, None]
    else:
        rows, cols = B, F
        scale_rows = scale[:, None]
    x2 = x.reshape(rows, cols)

    if cols * itemsize <= target_bytes:
        lt = cols                                   # full extent (masked lane stores
    else:                                           # if cols % 128 != 0)
        lt = max(128, (target_bytes // (8 * itemsize)) // 128 * 128)
    bt = _pick_row_tile(rows, lt * itemsize, target_bytes, min_steps)
    grid = (_cdiv(rows, bt), _cdiv(cols, lt))       # edge blocks masked, no padding

    out = pl.pallas_call(
        _drop_path_row_scale_kernel,
        out_shape=jax.ShapeDtypeStruct((rows, cols), orig_dtype),
        grid=grid,
        in_specs=[pl.BlockSpec((bt, 1), lambda i, j: (i, 0)),   # per-row scale
                  pl.BlockSpec((bt, lt), lambda i, j: (i, j))],  # activation tile
        out_specs=pl.BlockSpec((bt, lt), lambda i, j: (i, j)),
        compiler_params=pltpu.CompilerParams(
            dimension_semantics=("parallel", "parallel")),
        cost_estimate=cost,
    )(scale_rows, x2)
    return out.reshape(orig_shape)


class DropPath:
    """Drop paths (Stochastic Depth) per sample (main path of residual blocks)."""

    def __init__(self, drop_prob=None):
        self.drop_prob = drop_prob
        self.training = True

    def __call__(self, x, *, key=None):
        p = 0.0 if self.drop_prob is None else float(self.drop_prob)
        return drop_path(x, p, self.training, key=key)


if __name__ == "__main__":
    root = jax.random.PRNGKey(0)
    k_x1, k_m1, k_x2, k_m2, k_x3, k_m3, k_x4, k_m4 = jax.random.split(root, 8)

    drop_prob = 0.25
    keep_prob = 1.0 - drop_prob
    mod = DropPath(drop_prob)
    mod.training = True

    def reference(x, key):
        B = x.shape[0]
        u = jax.random.uniform(key, (B,), dtype=jnp.float32)
        mask = jnp.floor(keep_prob + u).reshape((B,) + (1,) * (x.ndim - 1))
        return (x.astype(jnp.float32) / keep_prob * mask).astype(x.dtype)

    # 1) NCHW activation, lane-aligned features (B=2, C=4, H=16, W=16 -> F=1024).
    x1 = jax.random.normal(k_x1, (2, 4, 16, 16), dtype=jnp.float32)
    y1 = jax.block_until_ready(mod(x1, key=k_m1))
    assert y1.shape == x1.shape and y1.dtype == x1.dtype
    assert jnp.allclose(y1, reference(x1, k_m1), atol=1e-5, rtol=1e-5)

    # 2) Transformer-style (B, N, C) with a ragged feature count (F = 7*20 = 140):
    #    exercises the masked-lane-store path (no padding anywhere).
    x2 = jax.random.normal(k_x2, (2, 7, 20), dtype=jnp.float32)
    y2 = jax.block_until_ready(mod(x2, key=k_m2))
    assert y2.shape == x2.shape and y2.dtype == x2.dtype
    assert jnp.allclose(y2, reference(x2, k_m2), atol=1e-5, rtol=1e-5)

    # 3) bf16 slab exercising the fat-sublane row-scale path.
    x3 = jax.random.normal(k_x3, (4, 64, 32, 32), dtype=jnp.bfloat16)
    y3 = jax.block_until_ready(mod(x3, key=k_m3))
    assert y3.shape == x3.shape and y3.dtype == x3.dtype
    assert jnp.allclose(y3.astype(jnp.float32),
                        reference(x3, k_m3).astype(jnp.float32),
                        atol=5e-2, rtol=5e-2)

    # 4) Larger f32 activation (>= 1 MiB per sample) hitting the per-sample
    #    scalar-prefetch path; its row count is not a multiple of the row tile,
    #    so the masked partial edge block (which replaced wrapper padding) runs.
    x4 = jax.random.normal(k_x4, (2, 520, 2048), dtype=jnp.float32)
    y4 = jax.block_until_ready(mod(x4, key=k_m4))
    assert y4.shape == x4.shape and y4.dtype == x4.dtype
    assert jnp.allclose(y4, reference(x4, k_m4), atol=1e-5, rtol=1e-5)

    # 5) Eval path is identity (matches PyTorch semantics).
    mod.training = False
    y_eval = jax.block_until_ready(mod(x1))
    assert jnp.array_equal(y_eval, x1)

    print("KERNEL_OK")
</pallas_src>

<mosaic_0001>
module attributes {stable_mosaic.version = 11 : i64} {
  func.func @_drop_path_row_scale_kernel(%arg0: i32, %arg1: i32, %arg2: memref<2x1xf32, #tpu.memory_space<vmem>>, %arg3: memref<2x1024xf32, #tpu.memory_space<vmem>>, %arg4: memref<2x1024xf32, #tpu.memory_space<vmem>>) attributes {dimension_semantics = [#tpu.dimension_semantics<parallel>, #tpu.dimension_semantics<parallel>], iteration_bounds = array<i64: 1, 1>, scalar_prefetch = 0 : i64, scratch_operands = 0 : i64, tpu.core_type = #tpu.core_type<tc>, window_params = [{transform_indices = @transform_0, window_bounds = array<i64: 2, 1>}, {transform_indices = @transform_1, window_bounds = array<i64: 2, 1024>}, {transform_indices = @transform_2, window_bounds = array<i64: 2, 1024>}]} {
    %c0 = arith.constant 0 : index
    %c0_0 = arith.constant 0 : index
    %0 = vector.load %arg3[%c0, %c0_0] : memref<2x1024xf32, #tpu.memory_space<vmem>>, vector<2x1024xf32>
    %c0_1 = arith.constant 0 : index
    %c0_2 = arith.constant 0 : index
    %1 = vector.load %arg2[%c0_1, %c0_2] : memref<2x1xf32, #tpu.memory_space<vmem>>, vector<2x1xf32>
    %2 = vector.broadcast %1 : vector<2x1xf32> to vector<2x1024xf32>
    %3 = arith.mulf %0, %2 : vector<2x1024xf32>
    %c0_3 = arith.constant 0 : index
    %c0_4 = arith.constant 0 : index
    %4 = vector.load %arg4[%c0_3, %c0_4] : memref<2x1024xf32, #tpu.memory_space<vmem>>, vector<2x1024xf32>
    tpu.vector_store %arg4[%c0_3, %c0_4], %3 {strides = array<i32>} : memref<2x1024xf32, #tpu.memory_space<vmem>>, vector<2x1024xf32>,
    return
  }
  func.func @transform_0(%arg0: i32, %arg1: i32) -> (i32, i32) {
    %c0_i32 = arith.constant 0 : i32
    %c0_i32_0 = arith.constant 0 : i32
    return %arg0, %c0_i32 : i32, i32
  }
  func.func @transform_1(%arg0: i32, %arg1: i32) -> (i32, i32) {
    %c0_i32 = arith.constant 0 : i32
    return %arg0, %arg1 : i32, i32
  }
  func.func @transform_2(%arg0: i32, %arg1: i32) -> (i32, i32) {
    %c0_i32 = arith.constant 0 : i32
    return %arg0, %arg1 : i32, i32
  }
}

</mosaic_0001>

<bundles_post_ra>
// kernel: tpu_custom_call.1
= control target key start
LH: loop header
LB: loop body
LE: loop exit
PB: predicated region body
PF: predicated region fallthrough
CT: control target
= control target key end

     0   :  { %7 = vsyncpa [#allocation3], 0  ;;  %s144_s0 = inlined_call_operand.vmem [shape: f32[2,1], index: 0, kind: input, shape index: {}]   ;;  %s145_s1 = inlined_call_operand.hbm [shape: f32[2,1024], index: 1, kind: input, shape index: {}]   ;;  %s146_s2 = inlined_call_operand.hbm [shape: f32[2,1024], index: 2, kind: output, shape index: {}]  }
   0x1   :  { %8 = vsyncpa [#allocation4], 0  ;;  %s16_s11 = sshll.u32 %s145_s1, 4  ;;  %s116_s12 = smov [#allocation2]   ;;  %s17_s11 = int_to_ptr.hbm [resolvable:$true] %s16_s11 }
   0x2   :  { %s18_s13 = sshll.u32 %s116_s12, 4  ;;  %s19_s13 = int_to_ptr.vmem [resolvable:$true] %s18_s13 }
   0x3   :  { %21 = dma.hbm_to_vmem [thread:$0]  %s17_s11, 256, %s19_s13, [#allocation3]  }
   0x4   :  { %112 = dma.done.wait [#allocation3], 256  }
   0x5   :  { %113 = vsyncadd [#allocation3], 4294967040  ;;  %v117_v0 = vmov 0   ;;  %v28_v1 = vld [vmem:[%s144_s0] sm:$0x3]  ;;  %v27_v7 = vld [vmem:[#allocation2 + $0x8] sm:$0xff] }
   0x6   :  { %63 = vset.pattern.permute.xlu0 %v117_v0  ;;  %v118_v2 = vmov 269488144   ;;  %v26_v6 = vld [vmem:[#allocation2] sm:$0xff]  ;;  %s119_s1 = smov [#allocation5]   ;;  %s49_s19 = sshll.u32 %s146_s2, 4  ;;  %s50_s19 = int_to_ptr.hbm [resolvable:$true] %s49_s19 }
   0x7   :  { %31 = vperm.xlu0 %63, %v28_v1   ;;  %v34_v3 = vunpack.c.l.s4 %v118_v2  ;;  %s47_s16 = sshll.u32 %s119_s1, 4  ;;  %s48_s16 = int_to_ptr.vmem [resolvable:$true] %s47_s16 }
   0x9   :  { %v35_v4 = vunpack.c.0.s8 %v34_v3 }
  0x79   :  { %v32_v5 = vpop.permute.xlu0 %31 }
  0x7a   :  { %v36_v8 = vperm.slane %v32_v5, %v35_v4 }
  0x7c   :  { %v38_v9 = vmul.f32 %v36_v8, %v26_v6  ;;  %v39_v10 = vmul.f32 %v36_v8, %v27_v7 }
  0x7e   :  { %40 = vst [vmem:[#allocation5] sm:$0xff] %v38_v9 }
  0x7f   :  { %41 = vst [vmem:[#allocation5 + $0x8] sm:$0xff] %v39_v10 }
  0x80   :  { %52 = dma.vmem_to_hbm [thread:$0]  %s48_s16, 256, %s50_s19, [#allocation4]  }
  0x81   :  { %114 = dma.done.wait [#allocation4], 256  }
  0x82   :  { %115 = vsyncadd [#allocation4], 4294967040 }
  0x83   :  { %57 = vsyncpa [#allocation3], 1 }
  0x84   :  { %58 = vsyncpa [#allocation4], 1 }

</bundles_post_ra>
